<compile_context>
chip_gen: v7x
topology: tpu7x:2x2x1
jax: 0.10.0
libtpu: 0.0.40
codegen_flags: <defaults>
</compile_context>

<pallas_src>
import math
import functools

import jax
import jax.numpy as jnp
from jax.experimental import pallas as pl
from jax.experimental.pallas import tpu as pltpu


def _data_embedding_kernel(x_ref, w_ref, pe_ref, o_ref, *, bt, L):
    # x_ref : (bt*L, c_in)        flattened rows of bt whole sequences
    # w_ref : (3, c_in, d_model)  conv taps (tap 0 = l-1, tap 1 = l, tap 2 = l+1)
    # pe_ref: (L, d_model)        positional embedding (constant across the grid)
    # o_ref : (bt*L, d_model)
    rows = bt * L
    x = x_ref[...]                                                  # (rows, c_in)

    if L == 1:
        # length-1 sequences: every circular tap sees the same row
        x_prev = x
        x_next = x
    else:
        # Per-sequence circular shifts from whole-block rolls (XLU slot) plus a
        # boundary fix-up select: row j of sequence i must wrap inside [i*L, (i+1)*L).
        r_p1 = pltpu.roll(x, shift=1, axis=0)                       # x[j-1]
        r_m1 = pltpu.roll(x, shift=rows - 1, axis=0)                # x[j+1]
        r_wrap_prev = pltpu.roll(x, shift=(rows - L + 1) % rows, axis=0)  # x[j+L-1]
        r_wrap_next = pltpu.roll(x, shift=L - 1, axis=0)            # x[j-L+1]
        pos = jax.lax.broadcasted_iota(jnp.int32, x.shape, 0) % L   # row index within seq
        x_prev = jnp.where(pos == 0, r_wrap_prev, r_p1)
        x_next = jnp.where(pos == L - 1, r_wrap_next, r_m1)

    # Three small-K dot-accumulates (MXU is nowhere near the bottleneck; this avoids the
    # XLU/VALU lane packing of a 3*c_in concat).  f32 accumulation.
    y = jnp.dot(x, w_ref[1], preferred_element_type=jnp.float32)
    y = y + jnp.dot(x_prev, w_ref[0], preferred_element_type=jnp.float32)
    y = y + jnp.dot(x_next, w_ref[2], preferred_element_type=jnp.float32)

    pe = pe_ref[...]                                                # (L, d_model)
    pe_blk = jnp.concatenate([pe] * bt, axis=0) if bt > 1 else pe   # (rows, d_model)

    # dropout p = 0.0 -> identity
    o_ref[...] = (y + pe_blk).astype(o_ref.dtype)


def _round_bt(bt, B, L):
    """Make bt*L a multiple of 8 (sublane tile) unless the block covers the whole batch."""
    if bt >= B:
        return B
    mult = 8 // math.gcd(L, 8)
    bt = max(mult, (bt // mult) * mult)
    return B if bt >= B else bt


def _choose_batch_block(B, L, d_model, out_itemsize):
    """Pick how many whole sequences (bt) go into one grid step."""
    # ~2 MiB of f32 compute rows per block saturates the HBM-write roofline (measured
    # ~85%+ at multi-MiB tiles); larger only adds VMEM pressure.  Floor keeps DMAs dense.
    target_rows = min(4096, max(256, (2 << 20) // (4 * d_model)))
    bt = min(B, 256, max(1, target_rows // L))
    bt = _round_bt(bt, B, L)

    # Prefer an exact divisor of B close to the target (avoids a ragged last block),
    # but never degenerate to tiny blocks for prime/awkward B.
    if 0 < bt < B and B % bt != 0:
        for cand in range(bt, max(int(bt * 0.6), 1) - 1, -1):
            if B % cand == 0 and (cand * L) % 8 == 0:
                bt = cand
                break

    # Keep >= 2 grid steps when blocks stay >= ~512 KiB of output: v7x has 2 TensorCores
    # ("parallel" shards steps across them); elsewhere the extra step is ~0.35 us.
    if bt >= B and B > 1:
        half = _round_bt((B + 1) // 2, B, L)
        if half < B and half * L * d_model * out_itemsize >= (512 << 10):
            bt = half

    return max(1, min(bt, B))


def _vmem_limit_bytes(rows_blk, L, c_in, d_model, x_itemsize, out_itemsize):
    blk = 2 * rows_blk * (c_in * x_itemsize + d_model * out_itemsize)  # double-buffered I/O
    const = 2 * (L + 3 * c_in) * d_model * 4                           # pe + weights
    interm = 4 * rows_blk * d_model * 4                                # f32 temporaries headroom
    need = blk + const + interm + (4 << 20)
    try:
        physical = int(pltpu.get_tpu_info().vmem_capacity_bytes)
    except Exception:
        physical = 64 << 20        # assume the smallest physical VMEM (v7x) if unknown
    cap = max(physical * 3 // 4, 32 << 20)                             # leave headroom
    return int(min(max(need, 32 << 20), cap))


def data_embedding(x, w_taps, pe, *, out_dtype=None, block_batch=None):
    """x: (B, L, c_in), w_taps: (3, c_in, d_model), pe: (L, d_model).

    out_dtype=None keeps the module's f32 semantics; pass jnp.bfloat16 to halve the
    dominant HBM write traffic (accumulation stays f32 in-kernel).
    """
    B, L, c_in = x.shape
    three, c_in_w, d_model = w_taps.shape
    assert three == 3 and c_in_w == c_in
    assert pe.shape == (L, d_model)
    out_dtype = jnp.dtype(x.dtype if out_dtype is None else out_dtype)

    if block_batch is None:
        bt = _choose_batch_block(B, L, d_model, out_dtype.itemsize)
    else:
        bt = _round_bt(max(1, min(block_batch, B)), B, L)
    rows_blk = bt * L
    grid = (pl.cdiv(B, bt),)          # ragged last block is masked by Pallas

    vmem_limit = _vmem_limit_bytes(rows_blk, L, c_in, d_model,
                                   jnp.dtype(x.dtype).itemsize, out_dtype.itemsize)

    x2 = x.reshape(B * L, c_in)       # free reshape: kernel works on a 2-D row view
    kernel = functools.partial(_data_embedding_kernel, bt=bt, L=L)

    out2 = pl.pallas_call(
        kernel,
        out_shape=jax.ShapeDtypeStruct((B * L, d_model), out_dtype),
        grid_spec=pltpu.PrefetchScalarGridSpec(
            num_scalar_prefetch=0,
            grid=grid,
            in_specs=[
                pl.BlockSpec((rows_blk, c_in), lambda b: (b, 0)),
                pl.BlockSpec((3, c_in, d_model), lambda b: (0, 0, 0)),  # constant -> DMA'd once
                pl.BlockSpec((L, d_model), lambda b: (0, 0)),           # constant -> DMA'd once
            ],
            out_specs=pl.BlockSpec((rows_blk, d_model), lambda b: (b, 0)),
        ),
        compiler_params=pltpu.CompilerParams(
            dimension_semantics=("parallel",),
            vmem_limit_bytes=vmem_limit,
        ),
    )(x2, w_taps, pe)
    return out2.reshape(B, L, d_model)


def make_positional_embedding(L, d_model):
    """Matches PositionalEmbedding buffer pe[:, :L] (without the leading batch dim)."""
    position = jnp.arange(L, dtype=jnp.float32)[:, None]                     # (L, 1)
    div_term = jnp.exp(jnp.arange(0, d_model, 2, dtype=jnp.float32)
                       * -(math.log(10000.0) / d_model))
    pe = jnp.zeros((L, d_model), jnp.float32)
    pe = pe.at[:, 0::2].set(jnp.sin(position * div_term))
    pe = pe.at[:, 1::2].set(jnp.cos(position * div_term))
    return pe


def make_token_conv_weight(key, c_in, d_model):
    """Deterministic kaiming_normal_(mode='fan_in', nonlinearity='leaky_relu') init.

    PyTorch weight shape is (d_model, c_in, 3); we return it tap-major and transposed
    as (3, c_in, d_model) for the in-kernel matmuls.
    """
    fan_in = c_in * 3
    gain = math.sqrt(2.0 / (1.0 + 0.01 ** 2))   # leaky_relu default negative_slope
    std = gain / math.sqrt(fan_in)
    w_torch = jax.random.normal(key, (d_model, c_in, 3), dtype=jnp.float32) * std
    return jnp.transpose(w_torch, (2, 1, 0))    # (3, c_in, d_model)


def data_embedding_reference(x, w_taps, pe):
    """Pure-JAX reference of the PyTorch forward (explicit circular pad)."""
    x_pad = jnp.concatenate([x[:, -1:, :], x, x[:, :1, :]], axis=1)
    L = x.shape[1]
    out = (jnp.einsum("blc,cd->bld", x_pad[:, 0:L], w_taps[0])
           + jnp.einsum("blc,cd->bld", x_pad[:, 1:L + 1], w_taps[1])
           + jnp.einsum("blc,cd->bld", x_pad[:, 2:L + 2], w_taps[2]))
    return out + pe[None]


if __name__ == "__main__":
    # small shapes; lane-dense d_model (>=128) keeps the output store unmasked
    B, L, c_in, d_model = 4, 16, 4, 128

    key = jax.random.PRNGKey(0)
    k_x, k_w = jax.random.split(key)

    x = jax.random.normal(k_x, (B, L, c_in), dtype=jnp.float32)
    w_taps = make_token_conv_weight(k_w, c_in, d_model)
    pe = make_positional_embedding(L, d_model)

    ref = data_embedding_reference(x, w_taps, pe)

    # f32 output (exact PyTorch module semantics)
    out = jax.block_until_ready(data_embedding(x, w_taps, pe))
    assert out.shape == (B, L, d_model) and out.dtype == jnp.float32
    assert jnp.allclose(out, ref, atol=1e-5, rtol=1e-5)

    # multi-step grid with a ragged last block (non-divisor block_batch, pl.cdiv grid)
    out_ragged = jax.block_until_ready(data_embedding(x, w_taps, pe, block_batch=3))
    assert jnp.allclose(out_ragged, ref, atol=1e-5, rtol=1e-5)

    # bf16 output path (halves dominant HBM write traffic; f32 accumulation in-kernel)
    out_bf16 = jax.block_until_ready(
        data_embedding(x, w_taps, pe, out_dtype=jnp.bfloat16))
    assert out_bf16.dtype == jnp.bfloat16
    assert jnp.allclose(out_bf16.astype(jnp.float32), ref, atol=5e-2, rtol=5e-2)

    print("KERNEL_OK")
</pallas_src>

<mosaic_0001>
module attributes {stable_mosaic.version = 11 : i64} {
  func.func @_data_embedding_kernel(%arg0: i32, %arg1: memref<64x4xf32, #tpu.memory_space<vmem>>, %arg2: memref<3x4x128xf32, #tpu.memory_space<vmem>>, %arg3: memref<16x128xf32, #tpu.memory_space<vmem>>, %arg4: memref<64x128xf32, #tpu.memory_space<vmem>>) attributes {dimension_semantics = [#tpu.dimension_semantics<parallel>], iteration_bounds = array<i64: 1>, scalar_prefetch = 0 : i64, scratch_operands = 0 : i64, tpu.core_type = #tpu.core_type<tc>, window_params = [{transform_indices = @transform_0, window_bounds = array<i64: 64, 4>}, {pipeline_mode = #tpu.pipeline_mode<synchronous>, transform_indices = @transform_1, window_bounds = array<i64: 3, 4, 128>}, {pipeline_mode = #tpu.pipeline_mode<synchronous>, transform_indices = @transform_2, window_bounds = array<i64: 16, 128>}, {transform_indices = @transform_3, window_bounds = array<i64: 64, 128>}]} {
    %c0 = arith.constant 0 : index
    %c0_0 = arith.constant 0 : index
    %0 = vector.load %arg1[%c0, %c0_0] : memref<64x4xf32, #tpu.memory_space<vmem>>, vector<64x4xf32>
    %c1_i32 = arith.constant 1 : i32
    %1 = tpu.dynamic_rotate %0 by %c1_i32 dim 0 : vector<64x4xf32>, i32 -> vector<64x4xf32>
    %c63_i32 = arith.constant 63 : i32
    %2 = tpu.dynamic_rotate %0 by %c63_i32 dim 0 : vector<64x4xf32>, i32 -> vector<64x4xf32>
    %c49_i32 = arith.constant 49 : i32
    %3 = tpu.dynamic_rotate %0 by %c49_i32 dim 0 : vector<64x4xf32>, i32 -> vector<64x4xf32>
    %c15_i32 = arith.constant 15 : i32
    %4 = tpu.dynamic_rotate %0 by %c15_i32 dim 0 : vector<64x4xf32>, i32 -> vector<64x4xf32>
    %5 = tpu.iota {dimensions = array<i32: 0>} : vector<64x4xi32>
    %c16_i32 = arith.constant 16 : i32
    %c0_i32 = arith.constant 0 : i32
    %6 = arith.cmpi eq, %c16_i32, %c0_i32 : i32
    %c1_i32_1 = arith.constant 1 : i32
    %7 = arith.select %6, %c1_i32_1, %c16_i32 : i32
    %8 = vector.broadcast %7 : i32 to vector<64x4xi32>
    %9 = arith.remsi %5, %8 : vector<64x4xi32>
    %c0_i32_2 = arith.constant 0 : i32
    %10 = vector.broadcast %c0_i32_2 : i32 to vector<64x4xi32>
    %11 = arith.cmpi ne, %9, %10 : vector<64x4xi32>
    %c0_i32_3 = arith.constant 0 : i32
    %12 = vector.broadcast %c0_i32_3 : i32 to vector<64x4xi32>
    %13 = arith.cmpi slt, %9, %12 : vector<64x4xi32>
    %c0_i32_4 = arith.constant 0 : i32
    %14 = arith.cmpi slt, %7, %c0_i32_4 : i32
    %15 = vector.broadcast %14 : i1 to vector<64x4xi1>
    %16 = vector.broadcast %15 : vector<64x4xi1> to vector<64x4xi1>
    %17 = arith.xori %13, %16 : vector<64x4xi1>
    %18 = arith.andi %17, %11 : vector<64x4xi1>
    %19 = vector.broadcast %7 : i32 to vector<64x4xi32>
    %20 = arith.addi %9, %19 : vector<64x4xi32>
    %21 = arith.select %18, %20, %9 : vector<64x4xi1>, vector<64x4xi32>
    %c0_i32_5 = arith.constant 0 : i32
    %22 = vector.broadcast %c0_i32_5 : i32 to vector<64x4xi32>
    %23 = arith.cmpi eq, %21, %22 : vector<64x4xi32>
    %24 = arith.select %23, %3, %1 : vector<64x4xi1>, vector<64x4xf32>
    %c15_i32_6 = arith.constant 15 : i32
    %25 = vector.broadcast %c15_i32_6 : i32 to vector<64x4xi32>
    %26 = arith.cmpi eq, %21, %25 : vector<64x4xi32>
    %27 = arith.select %26, %4, %2 : vector<64x4xi1>, vector<64x4xf32>
    %c1 = arith.constant 1 : index
    %c0_7 = arith.constant 0 : index
    %c0_8 = arith.constant 0 : index
    %28 = vector.load %arg2[%c1, %c0_7, %c0_8] : memref<3x4x128xf32, #tpu.memory_space<vmem>>, vector<1x4x128xf32>
    %29 = vector.shape_cast %28 : vector<1x4x128xf32> to vector<4x128xf32>
    %cst = arith.constant dense<0.000000e+00> : vector<64x128xf32>
    %30 = tpu.matmul %0, %29, %cst {dimension_numbers = #tpu.dot_dimension_numbers<[1], [0], [0], [1], [0, 0, 1, 1], [], []>} : vector<64x4xf32>, vector<4x128xf32>, vector<64x128xf32> -> vector<64x128xf32>
    %c0_9 = arith.constant 0 : index
    %c0_10 = arith.constant 0 : index
    %c0_11 = arith.constant 0 : index
    %31 = vector.load %arg2[%c0_9, %c0_10, %c0_11] : memref<3x4x128xf32, #tpu.memory_space<vmem>>, vector<1x4x128xf32>
    %32 = vector.shape_cast %31 : vector<1x4x128xf32> to vector<4x128xf32>
    %cst_12 = arith.constant dense<0.000000e+00> : vector<64x128xf32>
    %33 = tpu.matmul %24, %32, %cst_12 {dimension_numbers = #tpu.dot_dimension_numbers<[1], [0], [0], [1], [0, 0, 1, 1], [], []>} : vector<64x4xf32>, vector<4x128xf32>, vector<64x128xf32> -> vector<64x128xf32>
    %34 = arith.addf %30, %33 : vector<64x128xf32>
    %c2 = arith.constant 2 : index
    %c0_13 = arith.constant 0 : index
    %c0_14 = arith.constant 0 : index
    %35 = vector.load %arg2[%c2, %c0_13, %c0_14] : memref<3x4x128xf32, #tpu.memory_space<vmem>>, vector<1x4x128xf32>
    %36 = vector.shape_cast %35 : vector<1x4x128xf32> to vector<4x128xf32>
    %cst_15 = arith.constant dense<0.000000e+00> : vector<64x128xf32>
    %37 = tpu.matmul %27, %36, %cst_15 {dimension_numbers = #tpu.dot_dimension_numbers<[1], [0], [0], [1], [0, 0, 1, 1], [], []>} : vector<64x4xf32>, vector<4x128xf32>, vector<64x128xf32> -> vector<64x128xf32>
    %38 = arith.addf %34, %37 : vector<64x128xf32>
    %c0_16 = arith.constant 0 : index
    %c0_17 = arith.constant 0 : index
    %39 = vector.load %arg3[%c0_16, %c0_17] : memref<16x128xf32, #tpu.memory_space<vmem>>, vector<16x128xf32>
    %40 = tpu.concatenate %39, %39, %39, %39 in 0 : vector<16x128xf32>, vector<16x128xf32>, vector<16x128xf32>, vector<16x128xf32> -> vector<64x128xf32>
    %41 = arith.addf %38, %40 : vector<64x128xf32>
    %c0_18 = arith.constant 0 : index
    %c0_19 = arith.constant 0 : index
    %42 = vector.load %arg4[%c0_18, %c0_19] : memref<64x128xf32, #tpu.memory_space<vmem>>, vector<64x128xf32>
    tpu.vector_store %arg4[%c0_18, %c0_19], %41 {strides = array<i32>} : memref<64x128xf32, #tpu.memory_space<vmem>>, vector<64x128xf32>,
    return
  }
  func.func @transform_0(%arg0: i32) -> (i32, i32) {
    %c0_i32 = arith.constant 0 : i32
    %c0_i32_0 = arith.constant 0 : i32
    return %arg0, %c0_i32 : i32, i32
  }
  func.func @transform_1(%arg0: i32) -> (i32, i32, i32) {
    %c0_i32 = arith.constant 0 : i32
    %c0_i32_0 = arith.constant 0 : i32
    %c0_i32_1 = arith.constant 0 : i32
    %c0_i32_2 = arith.constant 0 : i32
    return %c0_i32, %c0_i32_0, %c0_i32_1 : i32, i32, i32
  }
  func.func @transform_2(%arg0: i32) -> (i32, i32) {
    %c0_i32 = arith.constant 0 : i32
    %c0_i32_0 = arith.constant 0 : i32
    %c0_i32_1 = arith.constant 0 : i32
    return %c0_i32, %c0_i32_0 : i32, i32
  }
  func.func @transform_3(%arg0: i32) -> (i32, i32) {
    %c0_i32 = arith.constant 0 : i32
    %c0_i32_0 = arith.constant 0 : i32
    return %arg0, %c0_i32 : i32, i32
  }
}

</mosaic_0001>

<bundles_post_ra>
// kernel: tpu_custom_call.1
= control target key start
LH: loop header
LB: loop body
LE: loop exit
PB: predicated region body
PF: predicated region fallthrough
CT: control target
= control target key end

     0   :  { %vm222_vm0 = vcmask 1043456   ;;  %v31_v3 = vlaneseq  ;;  %vm197_vm1 = vcmask 31744   ;;  %s969_s0 = inlined_call_operand.vmem [shape: f32[64,4], index: 0, kind: input, shape index: {}]   ;;  %s970_s1 = inlined_call_operand.vmem [shape: f32[3,4,128], index: 1, kind: input, shape index: {}]   ;;  %s971_s2 = inlined_call_operand.vmem [shape: f32[16,128], index: 2, kind: input, shape index: {}]   ;;  %s972_s3 = inlined_call_operand.hbm [shape: f32[64,128], index: 3, kind: output, shape index: {}]  }
   0x1   :  { %v808_v0 = vld [vmem:[%s970_s1 + $0x4] sm:$0xf]  ;;  %v816_v2 = vld [vmem:[%s969_s0 + $0x38] sm:$0xff]  ;;  %v16_v7 = vld [vmem:[%s969_s0 + $0x8] sm:$0xff] }
   0x2   :  { %v15_v1 = vld [vmem:[%s969_s0] sm:$0xff]  ;;  %709 = vmatprep.subr.msk.mxu0 %vm222_vm0, %v808_v0  ;;  %v49_v6 = vrot.slane %v816_v2, 1  ;;  %v830_v9 = vshrl.u32 %v31_v3, 7  ;;  %v24_v10 = vrot.slane %v16_v7, 7  ;;  %v43_v11 = vrot.slane %v16_v7, 1  ;;  %v17_v12 = vld [vmem:[%s969_s0 + $0x10] sm:$0xff] }
   0x3   :  { %v23_v4 = vrot.slane %v15_v1, 7  ;;  %v42_v5 = vrot.slane %v15_v1, 1  ;;  %711 = vmatprep.mubr.msk.f32.mxu0 %vm197_vm1, %v15_v1  ;;  %v196_v8 = vld [vmem:[%s970_s1] sm:$0xf]  ;;  %710 = vmatpush3.msk.msra.mxu0 %vm222_vm0, %v808_v0  ;;  %v18_v13 = vld [vmem:[%s969_s0 + $0x18] sm:$0xff]  ;;  %v30_v14 = vrot.slane %v816_v2, 7 }
   0x4   :  { %695 = vmatprep.subr.msk.mxu1 %vm222_vm0, %v196_v8  ;;  %712 = vmatmul.mubr.msk.f32.vlgmr.msra.gmra.mrb[0].mxu0 %vm197_vm1, %v16_v7  ;;  %v25_v15 = vrot.slane %v17_v12, 7  ;;  %v44_v16 = vrot.slane %v17_v12, 1  ;;  %v26_v17 = vrot.slane %v18_v13, 7  ;;  %v45_v18 = vrot.slane %v18_v13, 1  ;;  %v658_v19 = vld [vmem:[%s970_s1 + $0x8] sm:$0xf] }
   0x5   :  { %696 = vmatpush3.msk.msra.mxu1 %vm222_vm0, %v196_v8  ;;  %vm50_vm2 = vcmp.lt.s32.totalorder %v830_v9, 7  ;;  %714 = vmatprep.mubr.msk.f32.mxu0 %vm197_vm1, %v17_v12  ;;  %vm33_vm3 = vcmp.lt.s32.totalorder %v830_v9, 1  ;;  %v70_v20 = vand.u32 15, %v830_v9  ;;  %v59_v21 = vadd.s32 8, %v830_v9  ;;  %v855_v22 = vld [vmem:[%s969_s0 + $0x20] sm:$0xff] }
   0x6   :  { %737 = vmatprep.subr.msk.mxu1 %vm222_vm0, %v808_v0  ;;  %v861_v23 = vsel %vm50_vm2, %v49_v6, %v42_v5  ;;  %v56_v24 = vsel %vm50_vm2, %v43_v11, %v44_v16  ;;  %v39_v25 = vsel %vm33_vm3, %v24_v10, %v25_v15  ;;  %v871_v26 = vsel %vm33_vm3, %v30_v14, %v23_v4 }
   0x7   :  { %723 = vmatprep.subr.msk.mxu0 %vm222_vm0, %v658_v19 }
   0x8   :  { %8 = vsyncpa [#allocation3], 0  ;;  %vm162_vm4 = vcmp.eq.s32.totalorder %v70_v20, 0  ;;  %v40_v27 = vsel %vm33_vm3, %v23_v4, %v24_v10  ;;  %724 = vmatpush3.msk.msra.mxu0 %vm222_vm0, %v658_v19  ;;  %v57_v28 = vsel %vm50_vm2, %v42_v5, %v43_v11  ;;  %v77_v29 = vand.u32 15, %v59_v21  ;;  %v882_v30 = vld [vmem:[%s969_s0 + $0x28] sm:$0xff]  ;;  %v21_v34 = vld [vmem:[%s969_s0 + $0x30] sm:$0xff] }
   0x9   :  { %715 = vmatmul.mubr.msk.f32.gmra.mrb[2].mxu0 %vm197_vm1, %v18_v13  ;;  %v170_v31 = vsel %vm162_vm4, %v39_v25, %v871_v26  ;;  %v27_v32 = vrot.slane %v855_v22, 7  ;;  %v60_v33 = vadd.s32 16, %v830_v9  ;;  %v55_v35 = vsel %vm50_vm2, %v44_v16, %v45_v18  ;;  %v606_v8 = vld [vmem:[%s971_s2 + $0x8] sm:$0xff]  ;;  %v605_v11 = vld [vmem:[%s971_s2] sm:$0xff]  ;;  %s782_s2 = smov [#allocation2]  }
   0xa   :  { %697 = vmatprep.mubr.msk.f32.mxu1 %vm197_vm1, %v170_v31  ;;  %725 = vmatprep.mubr.msk.f32.mxu0 %vm197_vm1, %v57_v28  ;;  %vm179_vm5 = vcmp.eq.s32.totalorder %v77_v29, 15  ;;  %v46_v36 = vrot.slane %v855_v22, 1  ;;  %v61_v37 = vadd.s32 24, %v830_v9  ;;  %v28_v41 = vrot.slane %v882_v30, 7  ;;  %s628_s9 = sshll.u32 %s782_s2, 4  ;;  %s629_s9 = int_to_ptr.vmem [resolvable:$true] %s628_s9 }
   0xb   :  { %698 = vmatmul.mubr.msk.f32.vlgmr.msra.gmra.mrb[0].mxu1 %vm197_vm1, %v40_v27  ;;  %v187_v38 = vsel %vm179_vm5, %v861_v23, %v56_v24  ;;  %v37_v39 = vsel %vm33_vm3, %v26_v17, %v27_v32  ;;  %v84_v40 = vand.u32 15, %v60_v33  ;;  %v29_v44 = vrot.slane %v21_v34, 7  ;;  %s758_s10 = scalar_lea.vmem %s629_s9, 1024  ;;  %p763_p1 = scmp.lt.s32.totalorder %s629_s9, %s629_s9 }
   0xc   :  { %738 = vmatpush3.msk.msra.mxu1 %vm222_vm0, %v808_v0  ;;  %v54_v42 = vsel %vm50_vm2, %v45_v18, %v46_v36  ;;  %v91_v43 = vand.u32 15, %v61_v37  ;;  %v62_v45 = vadd.s32 32, %v830_v9  ;;  %v38_v46 = vsel %vm33_vm3, %v25_v15, %v26_v17  ;;  %p759_p0 = scmp.ne.s32.totalorder %s629_s9, %s758_s10  ;;  %p764_p2 = scmp.lt.s32.totalorder %s758_s10, %s758_s10 }
   0xd   :  { %726 = vmatmul.mubr.msk.f32.vlgmr.msra.gmra.mrb[0].mxu0 %vm197_vm1, %v187_v38  ;;  %vm164_vm6 = vcmp.eq.s32.totalorder %v84_v40, 0  ;;  %v64_v47 = vadd.s32 48, %v830_v9  ;;  %v47_v48 = vrot.slane %v882_v30, 1  ;;  %v35_v50 = vsel %vm33_vm3, %v28_v41, %v29_v44 }
   0xe   :  { %v172_v49 = vsel %vm164_vm6, %v37_v39, %v39_v25  ;;  %728 = vmatprep.mubr.msk.f32.mxu0 %vm197_vm1, %v55_v35  ;;  %vm181_vm7 = vcmp.eq.s32.totalorder %v91_v43, 15  ;;  %v98_v51 = vand.u32 15, %v62_v45  ;;  %v48_v55 = vrot.slane %v21_v34, 1  ;;  %p765_p3 = por %p764_p2, %p763_p1 }
   0xf   :  { %700 = vmatprep.mubr.msk.f32.mxu1 %vm197_vm1, %v172_v49  ;;  %v189_v52 = vsel %vm181_vm7, %v56_v24, %v54_v42  ;;  %v112_v53 = vand.u32 15, %v64_v47  ;;  %v53_v54 = vsel %vm50_vm2, %v46_v36, %v47_v48  ;;  %v63_v56 = vadd.s32 40, %v830_v9 }
  0x10   :  { %701 = vmatmul.mubr.msk.f32.gmra.mrb[2].mxu1 %vm197_vm1, %v38_v46  ;;  %vm166_vm8 = vcmp.eq.s32.totalorder %v98_v51, 0  ;;  %v65_v57 = vadd.s32 56, %v830_v9  ;;  %v36_v59 = vsel %vm33_vm3, %v27_v32, %v28_v41  ;;  %v52_v61 = vsel %vm50_vm2, %v47_v48, %v48_v55  ;;  %p766_p4 = pnand %p765_p3, %p759_p0 }
  0x11   :  { %729 = vmatmul.mubr.msk.f32.gmra.mrb[2].mxu0 %vm197_vm1, %v189_v52  ;;  %v174_v58 = vsel %vm166_vm8, %v35_v50, %v37_v39  ;;  %vm168_vm9 = vcmp.eq.s32.totalorder %v112_v53, 0  ;;  %v105_v62 = vand.u32 15, %v63_v56  ;;  %v51_v0 = vsel %vm50_vm2, %v48_v55, %v49_v6 }
  0x12   :  { %703 = vmatprep.mubr.msk.f32.mxu1 %vm197_vm1, %v174_v58  ;;  %v176_v60 = vsel %vm168_vm9, %v871_v26, %v35_v50  ;;  %731 = vmatprep.mubr.msk.f32.mxu0 %vm197_vm1, %v53_v54  ;;  %v119_v63 = vand.u32 15, %v65_v57  ;;  %v34_v1 = vsel %vm33_vm3, %v29_v44, %v30_v14 }
  0x13   :  { %vm183_vm10 = vcmp.eq.s32.totalorder %v105_v62, 15 }
  0x14   :  { %704 = vmatmul.mubr.msk.f32.gmra.mrb[4].mxu1 %vm197_vm1, %v36_v59  ;;  %v191_v3 = vsel %vm183_vm10, %v54_v42, %v52_v61  ;;  %vm185_vm11 = vcmp.eq.s32.totalorder %v119_v63, 15 }
  0x15   :  { %706 = vmatprep.mubr.msk.f32.mxu1 %vm197_vm1, %v176_v60  ;;  %732 = vmatmul.mubr.msk.f32.gmra.mrb[4].mxu0 %vm197_vm1, %v191_v3  ;;  %v193_v4 = vsel %vm185_vm11, %v52_v61, %v861_v23 }
  0x16   :  { %734 = vmatprep.mubr.msk.f32.mxu0 %vm197_vm1, %v51_v0 }
  0x18   :  { %707 = vmatmul.mubr.msk.f32.gmra.mrb[6].mxu1 %vm197_vm1, %v34_v1 }
  0x19   :  { %717 = vmatprep.mubr.msk.f32.mxu1 %vm197_vm1, %v855_v22  ;;  %735 = vmatmul.mubr.msk.f32.gmra.mrb[6].mxu0 %vm197_vm1, %v193_v4 }
  0x1c   :  { %718 = vmatmul.mubr.msk.f32.vlgmr.msra.gmra.mrb[4].mxu1 %vm197_vm1, %v882_v30 }
  0x1d   :  { %720 = vmatprep.mubr.msk.f32.mxu1 %vm197_vm1, %v21_v34 }
  0x20   :  { %721 = vmatmul.mubr.msk.f32.gmra.mrb[6].mxu1 %vm197_vm1, %v816_v2 }
  0xde   :  { %v699_v5 = vpop.f32.mrb[0].mxu1 }
  0xdf   :  { %v292_v6 = vpop.f32.mrb[1].mxu1 }
  0xe0   :  { %v727_v7 = vpop.f32.mrb[0].mxu0 }
  0xe1   :  { %v739_v9 = vadd.f32 %v727_v7, %v699_v5  ;;  %v558_v10 = vpop.f32.mrb[1].mxu0 }
  0xe2   :  { %v740_v12 = vadd.f32 %v558_v10, %v292_v6 }
  0xe3   :  { %v608_v13 = vadd.f32 %v739_v9, %v606_v8  ;;  %v702_v14 = vpop.f32.mrb[2].mxu1 }
  0xe4   :  { %v607_v15 = vadd.f32 %v740_v12, %v605_v11  ;;  %v302_v16 = vpop.f32.mrb[3].mxu1  ;;  %v730_v17 = vpop.f32.mrb[2].mxu0 }
  0xe5   :  { %616 = vst [vmem:[#allocation2 + $0x8] sm:$0xff] %v608_v13  ;;  %v741_v2 = vadd.f32 %v730_v17, %v702_v14  ;;  %v568_v18 = vpop.f32.mrb[3].mxu0 }
  0xe6   :  { %615 = vst [vmem:[#allocation2] sm:$0xff] %v607_v15  ;;  %v742_v19 = vadd.f32 %v568_v18, %v302_v16 }
  0xe7   :  { %v610_v20 = vadd.f32 %v741_v2, %v606_v8 }
  0xe8   :  { %v609_v21 = vadd.f32 %v742_v19, %v605_v11  ;;  %v733_v22 = vpop.f32.mrb[4].mxu0 }
  0xe9   :  { %618 = vst [vmem:[#allocation2 + $0x18] sm:$0xff] %v610_v20  ;;  %v578_v23 = vpop.f32.mrb[5].mxu0 }
  0xea   :  { %617 = vst [vmem:[#allocation2 + $0x10] sm:$0xff] %v609_v21 }
  0xec   :  { %v736_v24 = vpop.f32.mrb[6].mxu0 }
  0xed   :  { %v588_v25 = vpop.f32.mrb[7].mxu0 }
  0xef   :  { %v719_v26 = vpop.f32.mrb[4].mxu1 }
  0xf0   :  { %v743_v27 = vadd.f32 %v733_v22, %v719_v26  ;;  %v444_v28 = vpop.f32.mrb[5].mxu1 }
  0xf1   :  { %v744_v29 = vadd.f32 %v578_v23, %v444_v28 }
  0xf2   :  { %v612_v30 = vadd.f32 %v743_v27, %v606_v8 }
  0xf3   :  { %v611_v31 = vadd.f32 %v744_v29, %v605_v11  ;;  %v722_v32 = vpop.f32.mrb[6].mxu1 }
  0xf4   :  { %620 = vst [vmem:[#allocation2 + $0x28] sm:$0xff] %v612_v30  ;;  %v745_v33 = vadd.f32 %v736_v24, %v722_v32  ;;  %v454_v34 = vpop.f32.mrb[7].mxu1 }
  0xf5   :  { %619 = vst [vmem:[#allocation2 + $0x20] sm:$0xff] %v611_v31  ;;  %v746_v35 = vadd.f32 %v588_v25, %v454_v34 }
  0xf6   :  { %v614_v36 = vadd.f32 %v745_v33, %v606_v8 }
  0xf7   :  { %v613_v37 = vadd.f32 %v746_v35, %v605_v11 }
  0xf8   :  { %622 = vst [vmem:[#allocation2 + $0x38] sm:$0xff] %v614_v36 }
  0xf9   :  { %621 = vst [vmem:[#allocation2 + $0x30] sm:$0xff] %v613_v37 }
  0xfa   :  { %769 = shalt.err (!%p766_p4)
}
  0xfb   :  { %s770_s13 = scalar_lea.hbm %s972_s3, 1024 }
  0xfc   :  { %p771_p5 = scmp.ne.s32.totalorder %s972_s3, %s770_s13  ;;  %p774_p6 = scmp.lt.u32.totalorder %s770_s13, %s972_s3 }
  0xfe   :  { %p776_p7 = pnand %p774_p6, %p771_p5 }
 0x100   :  { %779 = shalt.err (!%p776_p7)
}
 0x101   :  { %s783_s18 = smov 128   ;;  %s784_s19 = smov 8  }
 0x102   :  { %634 = dma.vmem_to_hbm [thread:$0]  %s629_s9, 1024, %s972_s3, [#allocation3], %s783_s18, %s783_s18, %s784_s19  }
 0x103   :  { %780 = dma.done.wait [#allocation3], 1024  }
 0x104   :  { %781 = vsyncadd [#allocation3], 4294966272 }
 0x105   :  { %638 = vsyncpa [#allocation3], 1 }

</bundles_post_ra>
